<compile_context>
chip_gen: v6e
topology: v6e:2x2x1
jax: 0.10.0
libtpu: 0.0.40
codegen_flags: <defaults>
</compile_context>

<pallas_src>
import functools

import jax
import jax.numpy as jnp
from jax.experimental import pallas as pl
from jax.experimental.pallas import tpu as pltpu


# ----------------------------------------------------------------------------
# Kernel
# ----------------------------------------------------------------------------
def _critic_kernel(state_ref, action_ref,
                   w1s_ref, w1a_ref, b1_ref,
                   w2a_ref, b2a_ref,
                   w2b_ref, b2b_ref,
                   w3a_ref, w3b_ref, b3_ref,
                   q_ref):
    """One grid step: a [bm, S] / [bm, 1] row tile -> one [bm, 2] (q1,q2) tile."""
    hp = w2a_ref.shape[0]                      # padded hidden size (mult. of 128/256)
    wdt = w1s_ref.dtype                        # matmul weight dtype (bf16 or f32)

    x = state_ref[...]                         # [bm, S]  f32
    a = action_ref[...]                        # [bm, 1]  f32

    # ---- fused layer 1 (both heads in one MXU pass, 2*Hp result lanes) ------
    # Cast the LHS to the weight dtype so the MXU runs at native bf16 rate;
    # accumulation stays f32 via preferred_element_type.
    y = jnp.dot(x.astype(wdt), w1s_ref[...], preferred_element_type=jnp.float32)
    y = y + a * w1a_ref[...] + b1_ref[...]     # action column on the VPU (f32)
    y = jnp.maximum(y, 0.0)                    # [bm, 2*Hp] f32

    h = y[:, :hp]                              # static, 128/256-aligned lane slices
    g = y[:, hp:]

    # ---- layer 2 (one [Hp, Hp] matmul per head) -----------------------------
    h = jnp.maximum(
        jnp.dot(h.astype(wdt), w2a_ref[...],
                preferred_element_type=jnp.float32) + b2a_ref[...], 0.0)
    g = jnp.maximum(
        jnp.dot(g.astype(wdt), w2b_ref[...],
                preferred_element_type=jnp.float32) + b2b_ref[...], 0.0)

    # ---- layer 3 as VPU multiply + lane (XLU) reduction, no degenerate N=1 MXU
    q1 = jnp.sum(h * w3a_ref[...], axis=-1, keepdims=True)   # [bm, 1] f32
    q2 = jnp.sum(g * w3b_ref[...], axis=-1, keepdims=True)   # [bm, 1] f32

    b3 = b3_ref[...]                                          # [1, 2]  f32
    # Two direct slice stores (no cross-lane concat/relayout).
    q_ref[:, 0:1] = (q1 + b3[:, 0:1]).astype(q_ref.dtype)
    q_ref[:, 1:2] = (q2 + b3[:, 1:2]).astype(q_ref.dtype)


# ----------------------------------------------------------------------------
# Wrapper
# ----------------------------------------------------------------------------
def _round_up(x, m):
    return ((x + m - 1) // m) * m


def _const_spec(shape):
    """Resident, constant-index weight block; single-buffered to save VMEM."""
    idx = lambda i: (0,) * len(shape)
    try:
        return pl.BlockSpec(shape, idx, pipeline_mode=pl.Buffered(1))
    except (TypeError, ValueError):            # older jax: no pipeline_mode
        return pl.BlockSpec(shape, idx)


@functools.partial(jax.jit, static_argnames=("block_b",))
def critic_forward(state, action, fused_params, *, block_b=None):
    """Pallas-backed forward: returns (q1, q2), each [B, 1] float32.

    block_b: rows per grid step.  None (default) => one tile of up to 512 rows
    (best for single-TC v5e/v6e).  On dual-TC v7x pass e.g.
    block_b = max(128, round_up(cdiv(B, 2), 8)) so the 'parallel' grid axis
    can be sharded across both TensorCores (each TC re-fetches the weights,
    which is cheap once they are bf16 + single-buffered).
    """
    B, S = state.shape
    hp = fused_params["w2a"].shape[0]          # padded hidden size
    two_hp = 2 * hp

    # Default: one fat tile, capped at 512 rows so the [bm, 2*Hp] f32
    # intermediate stays small and large batches get >=2 pipelined steps.
    bm = min(B, 512) if block_b is None else block_b
    bm = max(8, _round_up(bm, 8))
    bp = _round_up(B, bm)
    if bp != B:                                # pad batch to a whole number of tiles
        pad = bp - B
        state = jnp.pad(state, ((0, pad), (0, 0)))
        action = jnp.pad(action, ((0, pad), (0, 0)))
    grid = (bp // bm,)

    in_specs = [
        pl.BlockSpec((bm, S), lambda i: (i, 0)),       # state row tile
        pl.BlockSpec((bm, 1), lambda i: (i, 0)),       # action row tile
        _const_spec((S, two_hp)),                      # fused fc1 (state rows)
        _const_spec((1, two_hp)),                      # fused fc1 (action row, f32)
        _const_spec((1, two_hp)),                      # fused fc1 bias (f32)
        _const_spec((hp, hp)), _const_spec((1, hp)),   # q1 fc2
        _const_spec((hp, hp)), _const_spec((1, hp)),   # q2 fc2
        _const_spec((1, hp)), _const_spec((1, hp)),    # fc3 reduce rows (f32)
        _const_spec((1, 2)),                           # fc3 biases (f32)
    ]
    out_specs = pl.BlockSpec((bm, 2), lambda i: (i, 0))
    out_shape = jax.ShapeDtypeStruct((bp, 2), jnp.float32)

    # ---- explicit scoped-VMEM budget (raises v5e's 16 MiB default, fits v7x)
    weight_bytes = sum(int(v.size) * v.dtype.itemsize
                       for v in fused_params.values())
    act_tile_bytes = bm * (S + 1 + 2) * 4            # state/action/out tiles
    inter_bytes = bm * two_hp * 4 * 3                # y + h/g f32 intermediates
    needed = 2 * weight_bytes + 2 * act_tile_bytes + inter_bytes
    vmem_limit = int(min(64 << 20, max(32 << 20, 2 * needed)))

    # Advisory cost estimate for XLA's scheduler.
    flops = 2 * bp * (S * two_hp + 2 * hp * hp + two_hp)
    io_bytes = weight_bytes + (bp * (S + 1) + bp * 2) * 4
    cost = pl.CostEstimate(flops=flops, transcendentals=0,
                           bytes_accessed=io_bytes)

    q = pl.pallas_call(
        _critic_kernel,
        grid=grid,
        in_specs=in_specs,
        out_specs=out_specs,
        out_shape=out_shape,
        cost_estimate=cost,
        compiler_params=pltpu.CompilerParams(
            dimension_semantics=("parallel",),
            vmem_limit_bytes=vmem_limit),
    )(state, action,
      fused_params["w1s"], fused_params["w1a"], fused_params["b1"],
      fused_params["w2a"], fused_params["b2a"],
      fused_params["w2b"], fused_params["b2b"],
      fused_params["w3a"], fused_params["w3b"], fused_params["b3"])

    q = q[:B]
    return q[:, 0:1], q[:, 1:2]


# ----------------------------------------------------------------------------
# Parameter initialization (raw, PyTorch-equivalent) and one-time fusion
# ----------------------------------------------------------------------------
def init_critic_params(key, state_dim, hidden_size):
    """Deterministic init mimicking nn.Linear's U(-1/sqrt(fan_in), 1/sqrt(fan_in)).

    Weights are stored as [in, out] (already transposed vs. PyTorch)."""
    d_in = state_dim + 1
    layer_dims = [
        ("w11", "b11", d_in, hidden_size),
        ("w12", "b12", hidden_size, hidden_size),
        ("w13", "b13", hidden_size, 1),
        ("w21", "b21", d_in, hidden_size),
        ("w22", "b22", hidden_size, hidden_size),
        ("w23", "b23", hidden_size, 1),
    ]
    params = {}
    keys = jax.random.split(key, 2 * len(layer_dims))
    for idx, (wname, bname, fi, fo) in enumerate(layer_dims):
        bound = 1.0 / (fi ** 0.5)
        params[wname] = jax.random.uniform(
            keys[2 * idx], (fi, fo), jnp.float32, minval=-bound, maxval=bound)
        params[bname] = jax.random.uniform(
            keys[2 * idx + 1], (1, fo), jnp.float32, minval=-bound, maxval=bound)
    return params


def fuse_critic_params(params, state_dim, weight_dtype=jnp.bfloat16,
                       hidden_align=256):
    """One-time weight prep: fuse the two heads' fc1, turn fc3 into reduce rows,
    zero-pad the hidden dim to a multiple of `hidden_align` (256 fills the
    v6e/v7x MXU; use 128 on v5e), and cast the big matmul weights to
    `weight_dtype` (bf16 halves weight DMA / VMEM; biases and the small VPU
    operands stay f32)."""
    S = state_dim
    H = params["w11"].shape[1]
    hp = _round_up(H, hidden_align)

    def pad_cols(x, n):
        return jnp.pad(x, ((0, 0), (0, n - x.shape[1])))

    def pad_rows(x, n):
        return jnp.pad(x, ((0, n - x.shape[0]), (0, 0)))

    w11, w21 = params["w11"], params["w21"]            # [S+1, H]
    mat = lambda x: x.astype(weight_dtype)              # MXU operands
    f32 = lambda x: x.astype(jnp.float32)                # VPU operands / biases
    fused = {
        # fused fc1, state rows / action row split
        "w1s": mat(jnp.concatenate([pad_cols(w11[:S], hp),
                                    pad_cols(w21[:S], hp)], axis=1)),     # [S, 2Hp]
        "w1a": f32(jnp.concatenate([pad_cols(w11[S:S + 1], hp),
                                    pad_cols(w21[S:S + 1], hp)], axis=1)),# [1, 2Hp]
        "b1":  f32(jnp.concatenate([pad_cols(params["b11"], hp),
                                    pad_cols(params["b21"], hp)], axis=1)),
        # per-head fc2, zero-padded to [Hp, Hp]
        "w2a": mat(pad_cols(pad_rows(params["w12"], hp), hp)),
        "b2a": f32(pad_cols(params["b12"], hp)),
        "w2b": mat(pad_cols(pad_rows(params["w22"], hp), hp)),
        "b2b": f32(pad_cols(params["b22"], hp)),
        # fc3 as broadcast rows for lane reduction (f32, VPU side)
        "w3a": f32(pad_cols(params["w13"].T, hp)),                        # [1, Hp]
        "w3b": f32(pad_cols(params["w23"].T, hp)),                        # [1, Hp]
        "b3":  f32(jnp.concatenate([params["b13"], params["b23"]], axis=1)),
    }
    return fused


def critic_forward_ref(state, action, params):
    """Pure-JAX reference on the raw (unfused) params, for correctness checking."""
    sa = jnp.concatenate([state, action], axis=1)
    h = jax.nn.relu(sa @ params["w11"] + params["b11"])
    h = jax.nn.relu(h @ params["w12"] + params["b12"])
    q1 = h @ params["w13"] + params["b13"]
    g = jax.nn.relu(sa @ params["w21"] + params["b21"])
    g = jax.nn.relu(g @ params["w22"] + params["b22"])
    q2 = g @ params["w23"] + params["b23"]
    return q1, q2


if __name__ == "__main__":
    state_dim = 8
    hidden_size = 32
    batch = 8

    key = jax.random.PRNGKey(0)
    k_param, k_state, k_action = jax.random.split(key, 3)

    params = init_critic_params(k_param, state_dim, hidden_size)
    state = jax.random.normal(k_state, (batch, state_dim), jnp.float32)
    action = jax.random.normal(k_action, (batch, 1), jnp.float32)

    q1_ref, q2_ref = critic_forward_ref(state, action, params)

    # ---- f32 weight path: tight correctness check ---------------------------
    fused_f32 = fuse_critic_params(params, state_dim, weight_dtype=jnp.float32)
    q1, q2 = critic_forward(state, action, fused_f32)
    jax.block_until_ready((q1, q2))
    assert q1.shape == (batch, 1) and q2.shape == (batch, 1)
    assert jnp.allclose(q1, q1_ref, atol=1e-4, rtol=1e-4)
    assert jnp.allclose(q2, q2_ref, atol=1e-4, rtol=1e-4)

    # ---- default bf16 weight path (the perf config): loose tolerance --------
    fused_bf16 = fuse_critic_params(params, state_dim)   # bf16 weights, 256-pad
    q1b, q2b = critic_forward(state, action, fused_bf16)
    jax.block_until_ready((q1b, q2b))
    assert jnp.allclose(q1b, q1_ref, atol=5e-2, rtol=5e-2)
    assert jnp.allclose(q2b, q2_ref, atol=5e-2, rtol=5e-2)

    # ---- non-divisible batch + multi-program path (tail padding, >=2 steps) -
    b2 = 13
    k_s2, k_a2 = jax.random.split(jax.random.PRNGKey(1))
    s2 = jax.random.normal(k_s2, (b2, state_dim), jnp.float32)
    a2 = jax.random.normal(k_a2, (b2, 1), jnp.float32)
    q1c, q2c = critic_forward(s2, a2, fused_f32, block_b=8)
    jax.block_until_ready((q1c, q2c))
    q1c_ref, q2c_ref = critic_forward_ref(s2, a2, params)
    assert q1c.shape == (b2, 1) and q2c.shape == (b2, 1)
    assert jnp.allclose(q1c, q1c_ref, atol=1e-4, rtol=1e-4)
    assert jnp.allclose(q2c, q2c_ref, atol=1e-4, rtol=1e-4)

    print("KERNEL_OK")
</pallas_src>

<mosaic_0001>
module attributes {stable_mosaic.version = 11 : i64} {
  func.func @_critic_kernel(%arg0: i32, %arg1: memref<8x8xf32, #tpu.memory_space<vmem>>, %arg2: memref<8x1xf32, #tpu.memory_space<vmem>>, %arg3: memref<8x512xf32, #tpu.memory_space<vmem>>, %arg4: memref<1x512xf32, #tpu.memory_space<vmem>>, %arg5: memref<1x512xf32, #tpu.memory_space<vmem>>, %arg6: memref<256x256xf32, #tpu.memory_space<vmem>>, %arg7: memref<1x256xf32, #tpu.memory_space<vmem>>, %arg8: memref<256x256xf32, #tpu.memory_space<vmem>>, %arg9: memref<1x256xf32, #tpu.memory_space<vmem>>, %arg10: memref<1x256xf32, #tpu.memory_space<vmem>>, %arg11: memref<1x256xf32, #tpu.memory_space<vmem>>, %arg12: memref<1x2xf32, #tpu.memory_space<vmem>>, %arg13: memref<8x2xf32, #tpu.memory_space<vmem>>) attributes {dimension_semantics = [#tpu.dimension_semantics<parallel>], iteration_bounds = array<i64: 1>, scalar_prefetch = 0 : i64, scratch_operands = 0 : i64, tpu.core_type = #tpu.core_type<tc>, window_params = [{transform_indices = @transform_0, window_bounds = array<i64: 8, 8>}, {transform_indices = @transform_1, window_bounds = array<i64: 8, 1>}, {pipeline_mode = #tpu.pipeline_mode<synchronous>, transform_indices = @transform_2, window_bounds = array<i64: 8, 512>}, {pipeline_mode = #tpu.pipeline_mode<synchronous>, transform_indices = @transform_3, window_bounds = array<i64: 1, 512>}, {pipeline_mode = #tpu.pipeline_mode<synchronous>, transform_indices = @transform_4, window_bounds = array<i64: 1, 512>}, {pipeline_mode = #tpu.pipeline_mode<synchronous>, transform_indices = @transform_5, window_bounds = array<i64: 256, 256>}, {pipeline_mode = #tpu.pipeline_mode<synchronous>, transform_indices = @transform_6, window_bounds = array<i64: 1, 256>}, {pipeline_mode = #tpu.pipeline_mode<synchronous>, transform_indices = @transform_7, window_bounds = array<i64: 256, 256>}, {pipeline_mode = #tpu.pipeline_mode<synchronous>, transform_indices = @transform_8, window_bounds = array<i64: 1, 256>}, {pipeline_mode = #tpu.pipeline_mode<synchronous>, transform_indices = @transform_9, window_bounds = array<i64: 1, 256>}, {pipeline_mode = #tpu.pipeline_mode<synchronous>, transform_indices = @transform_10, window_bounds = array<i64: 1, 256>}, {pipeline_mode = #tpu.pipeline_mode<synchronous>, transform_indices = @transform_11, window_bounds = array<i64: 1, 2>}, {transform_indices = @transform_12, window_bounds = array<i64: 8, 2>}]} {
    %c0 = arith.constant 0 : index
    %c0_0 = arith.constant 0 : index
    %0 = vector.load %arg1[%c0, %c0_0] : memref<8x8xf32, #tpu.memory_space<vmem>>, vector<8x8xf32>
    %c0_1 = arith.constant 0 : index
    %c0_2 = arith.constant 0 : index
    %1 = vector.load %arg2[%c0_1, %c0_2] : memref<8x1xf32, #tpu.memory_space<vmem>>, vector<8x1xf32>
    %c0_3 = arith.constant 0 : index
    %c0_4 = arith.constant 0 : index
    %2 = vector.load %arg3[%c0_3, %c0_4] : memref<8x512xf32, #tpu.memory_space<vmem>>, vector<8x512xf32>
    %cst = arith.constant dense<0.000000e+00> : vector<8x512xf32>
    %3 = tpu.matmul %0, %2, %cst {dimension_numbers = #tpu.dot_dimension_numbers<[1], [0], [0], [1], [0, 0, 1, 1], [], []>} : vector<8x8xf32>, vector<8x512xf32>, vector<8x512xf32> -> vector<8x512xf32>
    %c0_5 = arith.constant 0 : index
    %c0_6 = arith.constant 0 : index
    %4 = vector.load %arg4[%c0_5, %c0_6] : memref<1x512xf32, #tpu.memory_space<vmem>>, vector<1x512xf32>
    %5 = vector.broadcast %1 : vector<8x1xf32> to vector<8x512xf32>
    %6 = vector.broadcast %4 : vector<1x512xf32> to vector<8x512xf32>
    %7 = arith.mulf %5, %6 : vector<8x512xf32>
    %8 = arith.addf %3, %7 : vector<8x512xf32>
    %c0_7 = arith.constant 0 : index
    %c0_8 = arith.constant 0 : index
    %9 = vector.load %arg5[%c0_7, %c0_8] : memref<1x512xf32, #tpu.memory_space<vmem>>, vector<1x512xf32>
    %10 = vector.broadcast %9 : vector<1x512xf32> to vector<8x512xf32>
    %11 = arith.addf %8, %10 : vector<8x512xf32>
    %cst_9 = arith.constant 0.000000e+00 : f32
    %12 = vector.broadcast %cst_9 : f32 to vector<8x512xf32>
    %13 = arith.maximumf %11, %12 : vector<8x512xf32>
    %14 = vector.extract_strided_slice %13 {offsets = [0, 0], sizes = [8, 256], strides = [1, 1]} : vector<8x512xf32> to vector<8x256xf32>
    %15 = vector.extract_strided_slice %13 {offsets = [0, 256], sizes = [8, 256], strides = [1, 1]} : vector<8x512xf32> to vector<8x256xf32>
    %c0_10 = arith.constant 0 : index
    %c0_11 = arith.constant 0 : index
    %16 = vector.load %arg6[%c0_10, %c0_11] : memref<256x256xf32, #tpu.memory_space<vmem>>, vector<256x256xf32>
    %cst_12 = arith.constant dense<0.000000e+00> : vector<8x256xf32>
    %17 = tpu.matmul %14, %16, %cst_12 {dimension_numbers = #tpu.dot_dimension_numbers<[1], [0], [0], [1], [0, 0, 1, 1], [], []>} : vector<8x256xf32>, vector<256x256xf32>, vector<8x256xf32> -> vector<8x256xf32>
    %c0_13 = arith.constant 0 : index
    %c0_14 = arith.constant 0 : index
    %18 = vector.load %arg7[%c0_13, %c0_14] : memref<1x256xf32, #tpu.memory_space<vmem>>, vector<1x256xf32>
    %19 = vector.broadcast %18 : vector<1x256xf32> to vector<8x256xf32>
    %20 = arith.addf %17, %19 : vector<8x256xf32>
    %cst_15 = arith.constant 0.000000e+00 : f32
    %21 = vector.broadcast %cst_15 : f32 to vector<8x256xf32>
    %22 = arith.maximumf %20, %21 : vector<8x256xf32>
    %c0_16 = arith.constant 0 : index
    %c0_17 = arith.constant 0 : index
    %23 = vector.load %arg8[%c0_16, %c0_17] : memref<256x256xf32, #tpu.memory_space<vmem>>, vector<256x256xf32>
    %cst_18 = arith.constant dense<0.000000e+00> : vector<8x256xf32>
    %24 = tpu.matmul %15, %23, %cst_18 {dimension_numbers = #tpu.dot_dimension_numbers<[1], [0], [0], [1], [0, 0, 1, 1], [], []>} : vector<8x256xf32>, vector<256x256xf32>, vector<8x256xf32> -> vector<8x256xf32>
    %c0_19 = arith.constant 0 : index
    %c0_20 = arith.constant 0 : index
    %25 = vector.load %arg9[%c0_19, %c0_20] : memref<1x256xf32, #tpu.memory_space<vmem>>, vector<1x256xf32>
    %26 = vector.broadcast %25 : vector<1x256xf32> to vector<8x256xf32>
    %27 = arith.addf %24, %26 : vector<8x256xf32>
    %cst_21 = arith.constant 0.000000e+00 : f32
    %28 = vector.broadcast %cst_21 : f32 to vector<8x256xf32>
    %29 = arith.maximumf %27, %28 : vector<8x256xf32>
    %c0_22 = arith.constant 0 : index
    %c0_23 = arith.constant 0 : index
    %30 = vector.load %arg10[%c0_22, %c0_23] : memref<1x256xf32, #tpu.memory_space<vmem>>, vector<1x256xf32>
    %31 = vector.broadcast %30 : vector<1x256xf32> to vector<8x256xf32>
    %32 = arith.mulf %22, %31 : vector<8x256xf32>
    %cst_24 = arith.constant dense<0.000000e+00> : vector<8xf32>
    %33 = vector.multi_reduction <add>, %32, %cst_24 [1] : vector<8x256xf32> to vector<8xf32>
    %34 = vector.shape_cast %33 : vector<8xf32> to vector<8x1xf32>
    %c0_25 = arith.constant 0 : index
    %c0_26 = arith.constant 0 : index
    %35 = vector.load %arg11[%c0_25, %c0_26] : memref<1x256xf32, #tpu.memory_space<vmem>>, vector<1x256xf32>
    %36 = vector.broadcast %35 : vector<1x256xf32> to vector<8x256xf32>
    %37 = arith.mulf %29, %36 : vector<8x256xf32>
    %cst_27 = arith.constant dense<0.000000e+00> : vector<8xf32>
    %38 = vector.multi_reduction <add>, %37, %cst_27 [1] : vector<8x256xf32> to vector<8xf32>
    %39 = vector.shape_cast %38 : vector<8xf32> to vector<8x1xf32>
    %c0_28 = arith.constant 0 : index
    %c0_29 = arith.constant 0 : index
    %40 = vector.load %arg12[%c0_28, %c0_29] : memref<1x2xf32, #tpu.memory_space<vmem>>, vector<1x2xf32>
    %41 = vector.extract_strided_slice %40 {offsets = [0, 0], sizes = [1, 1], strides = [1, 1]} : vector<1x2xf32> to vector<1x1xf32>
    %42 = vector.broadcast %41 : vector<1x1xf32> to vector<8x1xf32>
    %43 = arith.addf %34, %42 : vector<8x1xf32>
    %c0_30 = arith.constant 0 : index
    %c0_31 = arith.constant 0 : index
    %44 = vector.load %arg13[%c0_30, %c0_31] : memref<8x2xf32, #tpu.memory_space<vmem>>, vector<8x1xf32>
    tpu.vector_store %arg13[%c0_30, %c0_31], %43 {strides = array<i32>} : memref<8x2xf32, #tpu.memory_space<vmem>>, vector<8x1xf32>,
    %45 = vector.extract_strided_slice %40 {offsets = [0, 1], sizes = [1, 1], strides = [1, 1]} : vector<1x2xf32> to vector<1x1xf32>
    %46 = vector.broadcast %45 : vector<1x1xf32> to vector<8x1xf32>
    %47 = arith.addf %39, %46 : vector<8x1xf32>
    %c0_32 = arith.constant 0 : index
    %c1 = arith.constant 1 : index
    %48 = vector.load %arg13[%c0_32, %c1] : memref<8x2xf32, #tpu.memory_space<vmem>>, vector<8x1xf32>
    tpu.vector_store %arg13[%c0_32, %c1], %47 {strides = array<i32>} : memref<8x2xf32, #tpu.memory_space<vmem>>, vector<8x1xf32>,
    return
  }
  func.func @transform_0(%arg0: i32) -> (i32, i32) {
    %c0_i32 = arith.constant 0 : i32
    %c0_i32_0 = arith.constant 0 : i32
    return %arg0, %c0_i32 : i32, i32
  }
  func.func @transform_1(%arg0: i32) -> (i32, i32) {
    %c0_i32 = arith.constant 0 : i32
    %c0_i32_0 = arith.constant 0 : i32
    return %arg0, %c0_i32 : i32, i32
  }
  func.func @transform_2(%arg0: i32) -> (i32, i32) {
    %c0_i32 = arith.constant 0 : i32
    %c0_i32_0 = arith.constant 0 : i32
    %c0_i32_1 = arith.constant 0 : i32
    return %c0_i32, %c0_i32_0 : i32, i32
  }
  func.func @transform_3(%arg0: i32) -> (i32, i32) {
    %c0_i32 = arith.constant 0 : i32
    %c0_i32_0 = arith.constant 0 : i32
    %c0_i32_1 = arith.constant 0 : i32
    return %c0_i32, %c0_i32_0 : i32, i32
  }
  func.func @transform_4(%arg0: i32) -> (i32, i32) {
    %c0_i32 = arith.constant 0 : i32
    %c0_i32_0 = arith.constant 0 : i32
    %c0_i32_1 = arith.constant 0 : i32
    return %c0_i32, %c0_i32_0 : i32, i32
  }
  func.func @transform_5(%arg0: i32) -> (i32, i32) {
    %c0_i32 = arith.constant 0 : i32
    %c0_i32_0 = arith.constant 0 : i32
    %c0_i32_1 = arith.constant 0 : i32
    return %c0_i32, %c0_i32_0 : i32, i32
  }
  func.func @transform_6(%arg0: i32) -> (i32, i32) {
    %c0_i32 = arith.constant 0 : i32
    %c0_i32_0 = arith.constant 0 : i32
    %c0_i32_1 = arith.constant 0 : i32
    return %c0_i32, %c0_i32_0 : i32, i32
  }
  func.func @transform_7(%arg0: i32) -> (i32, i32) {
    %c0_i32 = arith.constant 0 : i32
    %c0_i32_0 = arith.constant 0 : i32
    %c0_i32_1 = arith.constant 0 : i32
    return %c0_i32, %c0_i32_0 : i32, i32
  }
  func.func @transform_8(%arg0: i32) -> (i32, i32) {
    %c0_i32 = arith.constant 0 : i32
    %c0_i32_0 = arith.constant 0 : i32
    %c0_i32_1 = arith.constant 0 : i32
    return %c0_i32, %c0_i32_0 : i32, i32
  }
  func.func @transform_9(%arg0: i32) -> (i32, i32) {
    %c0_i32 = arith.constant 0 : i32
    %c0_i32_0 = arith.constant 0 : i32
    %c0_i32_1 = arith.constant 0 : i32
    return %c0_i32, %c0_i32_0 : i32, i32
  }
  func.func @transform_10(%arg0: i32) -> (i32, i32) {
    %c0_i32 = arith.constant 0 : i32
    %c0_i32_0 = arith.constant 0 : i32
    %c0_i32_1 = arith.constant 0 : i32
    return %c0_i32, %c0_i32_0 : i32, i32
  }
  func.func @transform_11(%arg0: i32) -> (i32, i32) {
    %c0_i32 = arith.constant 0 : i32
    %c0_i32_0 = arith.constant 0 : i32
    %c0_i32_1 = arith.constant 0 : i32
    return %c0_i32, %c0_i32_0 : i32, i32
  }
  func.func @transform_12(%arg0: i32) -> (i32, i32) {
    %c0_i32 = arith.constant 0 : i32
    %c0_i32_0 = arith.constant 0 : i32
    return %arg0, %c0_i32 : i32, i32
  }
}

</mosaic_0001>

<bundles_post_ra>
// kernel: critic_forward.1
= control target key start
LH: loop header
LB: loop body
LE: loop exit
PB: predicated region body
PF: predicated region fallthrough
CT: control target
= control target key end

     0   :  { %17 = vsyncpa [#allocation3], 0  ;;  %s919_s0 = inlined_call_operand.vmem [shape: f32[8,8], index: 0, kind: input, shape index: {}]   ;;  %s920_s1 = inlined_call_operand.vmem [shape: f32[8,1], index: 1, kind: input, shape index: {}]   ;;  %s921_s2 = inlined_call_operand.hbm [shape: f32[8,512], index: 2, kind: input, shape index: {}]   ;;  %s922_s3 = inlined_call_operand.vmem [shape: f32[1,512], index: 3, kind: input, shape index: {}]   ;;  %s923_s4 = inlined_call_operand.hbm [shape: f32[1,512], index: 4, kind: input, shape index: {}]   ;;  %s924_s5 = inlined_call_operand.hbm [shape: f32[256,256], index: 5, kind: input, shape index: {}]   ;;  %s925_s6 = inlined_call_operand.vmem [shape: f32[1,256], index: 6, kind: input, shape index: {}]   ;;  %s926_s7 = inlined_call_operand.hbm [shape: f32[256,256], index: 7, kind: input, shape index: {}]   ;;  %s927_s8 = inlined_call_operand.vmem [shape: f32[1,256], index: 8, kind: input, shape index: {}]   ;;  %s928_s9 = inlined_call_operand.vmem [shape: f32[1,256], index: 9, kind: input, shape index: {}]   ;;  %s929_s10 = inlined_call_operand.vmem [shape: f32[1,256], index: 10, kind: input, shape index: {}]   ;;  %s930_s11 = inlined_call_operand.hbm [shape: f32[1,2], index: 11, kind: input, shape index: {}]   ;;  %s931_s12 = inlined_call_operand.vmem [shape: f32[8,2], index: 12, kind: output, shape index: {}]  }
   0x1   :  { %18 = vsyncpa [#allocation5], 0 }
   0x2   :  { %19 = vsyncpa [#allocation8], 0  ;;  %s787_s21 = smov [#allocation4]  }
   0x3   :  { %s42_s22 = sshll.u32 %s787_s21, 4  ;;  %s43_s22 = int_to_ptr.vmem [resolvable:$true] %s42_s22 }
   0x4   :  { %s689_s23 = scalar_lea.vmem %s43_s22, 64  ;;  %p694_p1 = scmp.lt.s32.totalorder %s43_s22, %s43_s22 }
   0x5   :  { %p690_p0 = scmp.ne.s32.totalorder %s43_s22, %s689_s23  ;;  %p695_p2 = scmp.lt.s32.totalorder %s689_s23, %s689_s23 }
   0x7   :  { %p696_p3 = por %p695_p2, %p694_p1 }
   0x9   :  { %p697_p4 = pnand %p696_p3, %p690_p0 }
   0xb   :  { %700 = shalt.err (!%p697_p4)
}
   0xc   :  { %45 = dma.hbm_to_vmem [thread:$0]  %s923_s4, 64, %s43_s22, [#allocation5]  }
   0xd   :  { %s788_s26 = smov [#allocation7]   ;;  %s789_s28 = smov [#allocation2]  }
   0xe   :  { %s65_s27 = sshll.u32 %s788_s26, 4  ;;  %s30_s29 = sshll.u32 %s789_s28, 4  ;;  %s66_s27 = int_to_ptr.vmem [resolvable:$true] %s65_s27  ;;  %s31_s29 = int_to_ptr.vmem [resolvable:$true] %s30_s29 }
   0xf   :  { %s709_s30 = scalar_lea.vmem %s66_s27, 8192  ;;  %p714_p6 = scmp.lt.s32.totalorder %s66_s27, %s66_s27 }
  0x10   :  { %p710_p5 = scmp.ne.s32.totalorder %s66_s27, %s709_s30  ;;  %p715_p7 = scmp.lt.s32.totalorder %s709_s30, %s709_s30 }
  0x12   :  { %p716_p8 = por %p715_p7, %p714_p6 }
  0x14   :  { %p717_p9 = pnand %p716_p8, %p710_p5 }
  0x16   :  { %720 = shalt.err (!%p717_p9)
}
  0x17   :  { %s790_s13 = smov 256   ;;  %s791_s14 = smov 16  }
  0x18   :  { %71 = dma.hbm_to_vmem [thread:$0]  %s926_s7, 8192, %s66_s27, [#allocation8], %s790_s13, %s790_s13, %s791_s14  }
  0x19   :  { %s729_s4 = scalar_lea.vmem %s31_s29, 512  ;;  %p734_p11 = scmp.lt.s32.totalorder %s31_s29, %s31_s29 }
  0x1a   :  { %p730_p10 = scmp.ne.s32.totalorder %s31_s29, %s729_s4  ;;  %p735_p12 = scmp.lt.s32.totalorder %s729_s4, %s729_s4 }
  0x1c   :  { %p736_p13 = por %p735_p12, %p734_p11 }
  0x1e   :  { %p737_p0 = pnand %p736_p13, %p730_p10 }
  0x20   :  { %740 = shalt.err (!%p737_p0)
}
  0x21   :  { %33 = dma.hbm_to_vmem [thread:$0]  %s921_s2, 512, %s31_s29, [#allocation3]  }
  0x22   :  { %s792_s19 = smov [#allocation6]   ;;  %s793_s21 = smov [#allocation9]  }
  0x23   :  { %s51_s20 = sshll.u32 %s792_s19, 4  ;;  %s84_s22 = sshll.u32 %s793_s21, 4  ;;  %s52_s20 = int_to_ptr.vmem [resolvable:$true] %s51_s20  ;;  %s85_s22 = int_to_ptr.vmem [resolvable:$true] %s84_s22 }
  0x24   :  { %s749_s23 = scalar_lea.vmem %s52_s20, 8192  ;;  %p754_p2 = scmp.lt.s32.totalorder %s52_s20, %s52_s20 }
  0x25   :  { %p750_p1 = scmp.ne.s32.totalorder %s52_s20, %s749_s23  ;;  %p755_p3 = scmp.lt.s32.totalorder %s749_s23, %s749_s23 }
  0x27   :  { %p756_p4 = por %p755_p3, %p754_p2 }
  0x29   :  { %p757_p5 = pnand %p756_p4, %p750_p1 }
  0x2b   :  { %760 = shalt.err (!%p757_p5)
}
  0x2c   :  { %57 = dma.hbm_to_vmem [thread:$0]  %s924_s5, 8192, %s52_s20, [#allocation5], %s790_s13, %s790_s13, %s791_s14  }
  0x2d   :  { %s769_s25 = scalar_lea.vmem %s85_s22, 16  ;;  %s773_s2 = scalar_lea.vmem %s85_s22, 32 }
  0x2e   :  { %p770_p6 = scmp.ne.s32.totalorder %s85_s22, %s769_s25  ;;  %p774_p7 = scmp.lt.s32.totalorder %s85_s22, %s85_s22 }
  0x2f   :  { %p775_p8 = scmp.lt.s32.totalorder %s773_s2, %s769_s25 }
  0x31   :  { %p776_p9 = por %p775_p8, %p774_p7 }
  0x33   :  { %p777_p10 = pnand %p776_p9, %p770_p6 }
  0x35   :  { %780 = shalt.err (!%p777_p10)
}
  0x36   :  { %87 = dma.hbm_to_vmem [thread:$0]  %s930_s11, 16, %s85_s22, [#allocation8]  }
  0x37   :  { %781 = dma.done.wait [#allocation3], 512  }
  0x38   :  { %782 = vsyncadd [#allocation3], 4294966784 }
  0x39   :  { %783 = dma.done.wait [#allocation5], 8256  }
  0x3a   :  { %784 = vsyncadd [#allocation5], 4294959040 }
  0x3b   :  { %785 = dma.done.wait [#allocation8], 8208  }
  0x3c   :  { %786 = vsyncadd [#allocation8], 4294959088  ;;  %v794_v0 = vmov 0.0   ;;  %v795_v1 = vmov 0   ;;  %v106_v2 = vld [vmem:[#allocation2 + $0x8] sm:$0xff]  ;;  %v108_v3 = vld [vmem:[#allocation2 + $0x18] sm:$0xff] }
  0x3d   :  { %208 = vmatprep.mubr.f32.mxu0 %v794_v0  ;;  %279 = vmatprep.mubr.f32.mxu1 %v794_v0  ;;  %v105_v4 = vld [vmem:[#allocation2] sm:$0xff]  ;;  %vm140_vm0 = vcmask 64512   ;;  %v107_v5 = vld [vmem:[#allocation2 + $0x10] sm:$0xff]  ;;  %vm656_vm1 = vcmask 7168   ;;  %vm659_vm2 = vcmask 15368  }
  0x3e   :  { %680 = vset.pattern.permute.xlu0 %v795_v1  ;;  %174 = vmatprep.subr.mxu0 %v106_v2  ;;  %v103_v6 = vld [vmem:[%s919_s0] sm:$0xff]  ;;  %v346_v10 = vld [vmem:[#allocation6 + $0xf0] sm:$0xff]  ;;  %v345_v12 = vld [vmem:[#allocation6 + $0xe8] sm:$0xff] }
  0x3f   :  { %245 = vmatprep.subr.mxu1 %v108_v3  ;;  %v104_v7 = vld [vmem:[%s920_s1] sm:$0xff]  ;;  %175 = vmatpush1.msra.mxu0 %v105_v4  ;;  %v495_v11 = vld [vmem:[#allocation7 + $0xf0] sm:$0xff]  ;;  %v494_v13 = vld [vmem:[#allocation7 + $0xe8] sm:$0xff] }
  0x40   :  { %246 = vmatpush1.msra.mxu1 %v107_v5  ;;  %v347_v8 = vld [vmem:[#allocation6 + $0xf8] sm:$0xff]  ;;  %668 = vmatmul.mubr.msk.f32.vlgmr.msra.gmra.mxu0 %vm140_vm0, %v103_v6  ;;  %v344_v14 = vld [vmem:[#allocation6 + $0xe0] sm:$0xff]  ;;  %v342_v18 = vld [vmem:[#allocation6 + $0xd0] sm:$0xff] }
  0x41   :  { %v496_v9 = vld [vmem:[#allocation7 + $0xf8] sm:$0xff]  ;;  %669 = vmatmul.mubr.msk.f32.vlgmr.msra.gmra.mxu1 %vm140_vm0, %v103_v6  ;;  %112 = vperm.xlu0 %680, %v104_v7   ;;  %v493_v15 = vld [vmem:[#allocation7 + $0xe0] sm:$0xff]  ;;  %v491_v19 = vld [vmem:[#allocation7 + $0xd0] sm:$0xff] }
  0x42   :  { %392 = vmatprep.subr.mxu0 %v347_v8  ;;  %541 = vmatprep.subr.mxu1 %v496_v9  ;;  %v343_v16 = vld [vmem:[#allocation6 + $0xd8] sm:$0xff]  ;;  %v341_v20 = vld [vmem:[#allocation6 + $0xc8] sm:$0xff]  ;;  %v340_v22 = vld [vmem:[#allocation6 + $0xc0] sm:$0xff] }
  0x43   :  { %393 = vmatpush1.msra.mxu0 %v346_v10  ;;  %542 = vmatpush1.msra.mxu1 %v495_v11  ;;  %v492_v17 = vld [vmem:[#allocation7 + $0xd8] sm:$0xff]  ;;  %v490_v21 = vld [vmem:[#allocation7 + $0xc8] sm:$0xff]  ;;  %v489_v23 = vld [vmem:[#allocation7 + $0xc0] sm:$0xff] }
  0x44   :  { %394 = vmatprep.subr.mxu0 %v345_v12  ;;  %543 = vmatprep.subr.mxu1 %v494_v13  ;;  %v339_v24 = vld [vmem:[#allocation6 + $0xb8] sm:$0xff]  ;;  %v338_v26 = vld [vmem:[#allocation6 + $0xb0] sm:$0xff]  ;;  %v337_v28 = vld [vmem:[#allocation6 + $0xa8] sm:$0xff] }
  0x45   :  { %395 = vmatpush1.msra.mxu0 %v344_v14  ;;  %544 = vmatpush1.msra.mxu1 %v493_v15  ;;  %v488_v25 = vld [vmem:[#allocation7 + $0xb8] sm:$0xff]  ;;  %v487_v27 = vld [vmem:[#allocation7 + $0xb0] sm:$0xff]  ;;  %v486_v29 = vld [vmem:[#allocation7 + $0xa8] sm:$0xff] }
  0x46   :  { %396 = vmatprep.subr.mxu0 %v343_v16  ;;  %545 = vmatprep.subr.mxu1 %v492_v17  ;;  %v336_v30 = vld [vmem:[#allocation6 + $0xa0] sm:$0xff]  ;;  %v335_v32 = vld [vmem:[#allocation6 + $0x98] sm:$0xff]  ;;  %v334_v34 = vld [vmem:[#allocation6 + $0x90] sm:$0xff] }
  0x47   :  { %397 = vmatpush1.msra.mxu0 %v342_v18  ;;  %546 = vmatpush1.msra.mxu1 %v491_v19  ;;  %v485_v31 = vld [vmem:[#allocation7 + $0xa0] sm:$0xff]  ;;  %v484_v33 = vld [vmem:[#allocation7 + $0x98] sm:$0xff]  ;;  %v483_v35 = vld [vmem:[#allocation7 + $0x90] sm:$0xff] }
  0x48   :  { %398 = vmatprep.subr.mxu0 %v341_v20  ;;  %547 = vmatprep.subr.mxu1 %v490_v21  ;;  %v333_v36 = vld [vmem:[#allocation6 + $0x88] sm:$0xff]  ;;  %v332_v38 = vld [vmem:[#allocation6 + $0x80] sm:$0xff]  ;;  %v331_v40 = vld [vmem:[#allocation6 + $0x78] sm:$0xff] }
  0x49   :  { %399 = vmatpush1.msra.mxu0 %v340_v22  ;;  %548 = vmatpush1.msra.mxu1 %v489_v23  ;;  %v482_v37 = vld [vmem:[#allocation7 + $0x88] sm:$0xff]  ;;  %v481_v39 = vld [vmem:[#allocation7 + $0x80] sm:$0xff]  ;;  %v480_v41 = vld [vmem:[#allocation7 + $0x78] sm:$0xff] }
  0x4a   :  { %400 = vmatprep.subr.mxu0 %v339_v24  ;;  %549 = vmatprep.subr.mxu1 %v488_v25  ;;  %v330_v42 = vld [vmem:[#allocation6 + $0x70] sm:$0xff]  ;;  %v329_v44 = vld [vmem:[#allocation6 + $0x68] sm:$0xff]  ;;  %v328_v46 = vld [vmem:[#allocation6 + $0x60] sm:$0xff] }
  0x4b   :  { %401 = vmatpush1.msra.mxu0 %v338_v26  ;;  %550 = vmatpush1.msra.mxu1 %v487_v27  ;;  %v479_v43 = vld [vmem:[#allocation7 + $0x70] sm:$0xff]  ;;  %v478_v45 = vld [vmem:[#allocation7 + $0x68] sm:$0xff]  ;;  %v477_v47 = vld [vmem:[#allocation7 + $0x60] sm:$0xff] }
  0x4c   :  { %402 = vmatprep.subr.mxu0 %v337_v28  ;;  %551 = vmatprep.subr.mxu1 %v486_v29  ;;  %v327_v48 = vld [vmem:[#allocation6 + $0x58] sm:$0xff]  ;;  %v326_v50 = vld [vmem:[#allocation6 + $0x50] sm:$0xff]  ;;  %v325_v52 = vld [vmem:[#allocation6 + $0x48] sm:$0xff] }
  0x4d   :  { %403 = vmatpush1.msra.mxu0 %v336_v30  ;;  %552 = vmatpush1.msra.mxu1 %v485_v31  ;;  %v476_v49 = vld [vmem:[#allocation7 + $0x58] sm:$0xff]  ;;  %v475_v51 = vld [vmem:[#allocation7 + $0x50] sm:$0xff]  ;;  %v474_v53 = vld [vmem:[#allocation7 + $0x48] sm:$0xff] }
  0x4e   :  { %404 = vmatprep.subr.mxu0 %v335_v32  ;;  %553 = vmatprep.subr.mxu1 %v484_v33  ;;  %v324_v54 = vld [vmem:[#allocation6 + $0x40] sm:$0xff]  ;;  %v323_v56 = vld [vmem:[#allocation6 + $0x38] sm:$0xff]  ;;  %v322_v58 = vld [vmem:[#allocation6 + $0x30] sm:$0xff] }
  0x4f   :  { %405 = vmatpush1.msra.mxu0 %v334_v34  ;;  %554 = vmatpush1.msra.mxu1 %v483_v35  ;;  %v473_v55 = vld [vmem:[#allocation7 + $0x40] sm:$0xff]  ;;  %v472_v57 = vld [vmem:[#allocation7 + $0x38] sm:$0xff]  ;;  %v471_v59 = vld [vmem:[#allocation7 + $0x30] sm:$0xff] }
  0x50   :  { %406 = vmatprep.subr.mxu0 %v333_v36  ;;  %555 = vmatprep.subr.mxu1 %v482_v37  ;;  %v321_v60 = vld [vmem:[#allocation6 + $0x28] sm:$0xff]  ;;  %v320_v62 = vld [vmem:[#allocation6 + $0x20] sm:$0xff]  ;;  %v319_v0 = vld [vmem:[#allocation6 + $0x18] sm:$0xff] }
  0x51   :  { %407 = vmatpush1.msra.mxu0 %v332_v38  ;;  %556 = vmatpush1.msra.mxu1 %v481_v39  ;;  %v470_v61 = vld [vmem:[#allocation7 + $0x28] sm:$0xff]  ;;  %v469_v63 = vld [vmem:[#allocation7 + $0x20] sm:$0xff]  ;;  %v468_v1 = vld [vmem:[#allocation7 + $0x18] sm:$0xff] }
  0x52   :  { %408 = vmatprep.subr.mxu0 %v331_v40  ;;  %557 = vmatprep.subr.mxu1 %v480_v41  ;;  %v318_v2 = vld [vmem:[#allocation6 + $0x10] sm:$0xff]  ;;  %v317_v4 = vld [vmem:[#allocation6 + $0x8] sm:$0xff]  ;;  %v316_v6 = vld [vmem:[#allocation6] sm:$0xff] }
  0x53   :  { %409 = vmatpush1.msra.mxu0 %v330_v42  ;;  %558 = vmatpush1.msra.mxu1 %v479_v43  ;;  %v467_v3 = vld [vmem:[#allocation7 + $0x10] sm:$0xff]  ;;  %v466_v5 = vld [vmem:[#allocation7 + $0x8] sm:$0xff]  ;;  %v465_v7 = vld [vmem:[#allocation7] sm:$0xff] }
  0x54   :  { %410 = vmatprep.subr.mxu0 %v329_v44  ;;  %559 = vmatprep.subr.mxu1 %v478_v45  ;;  %v379_v8 = vld [vmem:[#allocation6 + $0x1f8] sm:$0xff]  ;;  %v378_v10 = vld [vmem:[#allocation6 + $0x1f0] sm:$0xff]  ;;  %v377_v12 = vld [vmem:[#allocation6 + $0x1e8] sm:$0xff] }
  0x55   :  { %411 = vmatpush1.msra.mxu0 %v328_v46  ;;  %560 = vmatpush1.msra.mxu1 %v477_v47  ;;  %v528_v9 = vld [vmem:[#allocation7 + $0x1f8] sm:$0xff]  ;;  %v527_v11 = vld [vmem:[#allocation7 + $0x1f0] sm:$0xff]  ;;  %v526_v13 = vld [vmem:[#allocation7 + $0x1e8] sm:$0xff] }
  0x56   :  { %412 = vmatprep.subr.mxu0 %v327_v48  ;;  %561 = vmatprep.subr.mxu1 %v476_v49  ;;  %v376_v14 = vld [vmem:[#allocation6 + $0x1e0] sm:$0xff]  ;;  %v375_v16 = vld [vmem:[#allocation6 + $0x1d8] sm:$0xff]  ;;  %v374_v18 = vld [vmem:[#allocation6 + $0x1d0] sm:$0xff] }
  0x57   :  { %413 = vmatpush1.msra.mxu0 %v326_v50  ;;  %562 = vmatpush1.msra.mxu1 %v475_v51  ;;  %v525_v15 = vld [vmem:[#allocation7 + $0x1e0] sm:$0xff]  ;;  %v524_v17 = vld [vmem:[#allocation7 + $0x1d8] sm:$0xff]  ;;  %v523_v19 = vld [vmem:[#allocation7 + $0x1d0] sm:$0xff] }
  0x58   :  { %414 = vmatprep.subr.mxu0 %v325_v52  ;;  %563 = vmatprep.subr.mxu1 %v474_v53  ;;  %v373_v20 = vld [vmem:[#allocation6 + $0x1c8] sm:$0xff]  ;;  %v372_v22 = vld [vmem:[#allocation6 + $0x1c0] sm:$0xff]  ;;  %v371_v24 = vld [vmem:[#allocation6 + $0x1b8] sm:$0xff] }
  0x59   :  { %415 = vmatpush1.msra.mxu0 %v324_v54  ;;  %564 = vmatpush1.msra.mxu1 %v473_v55  ;;  %v522_v21 = vld [vmem:[#allocation7 + $0x1c8] sm:$0xff]  ;;  %v521_v23 = vld [vmem:[#allocation7 + $0x1c0] sm:$0xff]  ;;  %v520_v25 = vld [vmem:[#allocation7 + $0x1b8] sm:$0xff] }
  0x5a   :  { %416 = vmatprep.subr.mxu0 %v323_v56  ;;  %565 = vmatprep.subr.mxu1 %v472_v57  ;;  %v370_v26 = vld [vmem:[#allocation6 + $0x1b0] sm:$0xff]  ;;  %v369_v28 = vld [vmem:[#allocation6 + $0x1a8] sm:$0xff]  ;;  %v368_v30 = vld [vmem:[#allocation6 + $0x1a0] sm:$0xff] }
  0x5b   :  { %417 = vmatpush1.msra.mxu0 %v322_v58  ;;  %566 = vmatpush1.msra.mxu1 %v471_v59  ;;  %v519_v27 = vld [vmem:[#allocation7 + $0x1b0] sm:$0xff]  ;;  %v518_v29 = vld [vmem:[#allocation7 + $0x1a8] sm:$0xff]  ;;  %v517_v31 = vld [vmem:[#allocation7 + $0x1a0] sm:$0xff] }
  0x5c   :  { %418 = vmatprep.subr.mxu0 %v321_v60  ;;  %567 = vmatprep.subr.mxu1 %v470_v61  ;;  %v367_v32 = vld [vmem:[#allocation6 + $0x198] sm:$0xff]  ;;  %v366_v34 = vld [vmem:[#allocation6 + $0x190] sm:$0xff]  ;;  %v365_v36 = vld [vmem:[#allocation6 + $0x188] sm:$0xff] }
  0x5d   :  { %419 = vmatpush1.msra.mxu0 %v320_v62  ;;  %568 = vmatpush1.msra.mxu1 %v469_v63  ;;  %v516_v33 = vld [vmem:[#allocation7 + $0x198] sm:$0xff]  ;;  %v515_v35 = vld [vmem:[#allocation7 + $0x190] sm:$0xff]  ;;  %v514_v37 = vld [vmem:[#allocation7 + $0x188] sm:$0xff] }
  0x5e   :  { %420 = vmatprep.subr.mxu0 %v319_v0  ;;  %569 = vmatprep.subr.mxu1 %v468_v1  ;;  %v364_v38 = vld [vmem:[#allocation6 + $0x180] sm:$0xff]  ;;  %v363_v40 = vld [vmem:[#allocation6 + $0x178] sm:$0xff]  ;;  %v362_v42 = vld [vmem:[#allocation6 + $0x170] sm:$0xff] }
  0x5f   :  { %421 = vmatpush1.msra.mxu0 %v318_v2  ;;  %570 = vmatpush1.msra.mxu1 %v467_v3  ;;  %v513_v39 = vld [vmem:[#allocation7 + $0x180] sm:$0xff]  ;;  %v512_v41 = vld [vmem:[#allocation7 + $0x178] sm:$0xff]  ;;  %v511_v43 = vld [vmem:[#allocation7 + $0x170] sm:$0xff] }
  0x60   :  { %422 = vmatprep.subr.mxu0 %v317_v4  ;;  %571 = vmatprep.subr.mxu1 %v466_v5  ;;  %v361_v44 = vld [vmem:[#allocation6 + $0x168] sm:$0xff]  ;;  %v360_v46 = vld [vmem:[#allocation6 + $0x160] sm:$0xff]  ;;  %v359_v48 = vld [vmem:[#allocation6 + $0x158] sm:$0xff] }
  0x61   :  { %423 = vmatpush1.msra.mxu0 %v316_v6  ;;  %572 = vmatpush1.msra.mxu1 %v465_v7  ;;  %v510_v45 = vld [vmem:[#allocation7 + $0x168] sm:$0xff]  ;;  %v509_v47 = vld [vmem:[#allocation7 + $0x160] sm:$0xff]  ;;  %v508_v49 = vld [vmem:[#allocation7 + $0x158] sm:$0xff] }
  0x62   :  { %424 = vmatprep.subr.mxu0 %v379_v8  ;;  %573 = vmatprep.subr.mxu1 %v528_v9  ;;  %v358_v50 = vld [vmem:[#allocation6 + $0x150] sm:$0xff]  ;;  %v357_v52 = vld [vmem:[#allocation6 + $0x148] sm:$0xff]  ;;  %v356_v54 = vld [vmem:[#allocation6 + $0x140] sm:$0xff]  ;;  %v116_v8 = vlaneseq }
  0x63   :  { %425 = vmatpush2.msra.mxu0 %v378_v10  ;;  %574 = vmatpush2.msra.mxu1 %v527_v11  ;;  %v507_v51 = vld [vmem:[#allocation7 + $0x150] sm:$0xff]  ;;  %v506_v53 = vld [vmem:[#allocation7 + $0x148] sm:$0xff]  ;;  %v505_v55 = vld [vmem:[#allocation7 + $0x140] sm:$0xff] }
  0x64   :  { %426 = vmatprep.subr.mxu0 %v377_v12  ;;  %575 = vmatprep.subr.mxu1 %v526_v13  ;;  %v355_v56 = vld [vmem:[#allocation6 + $0x138] sm:$0xff]  ;;  %v354_v58 = vld [vmem:[#allocation6 + $0x130] sm:$0xff]  ;;  %v353_v60 = vld [vmem:[#allocation6 + $0x128] sm:$0xff]  ;;  %v117_v9 = vshrl.u32 %v116_v8, 7 }
  0x65   :  { %427 = vmatpush2.msra.mxu0 %v376_v14  ;;  %576 = vmatpush2.msra.mxu1 %v525_v15  ;;  %v504_v57 = vld [vmem:[#allocation7 + $0x138] sm:$0xff]  ;;  %v503_v59 = vld [vmem:[#allocation7 + $0x130] sm:$0xff]  ;;  %v502_v61 = vld [vmem:[#allocation7 + $0x128] sm:$0xff] }
  0x66   :  { %428 = vmatprep.subr.mxu0 %v375_v16  ;;  %577 = vmatprep.subr.mxu1 %v524_v17  ;;  %v352_v62 = vld [vmem:[#allocation6 + $0x120] sm:$0xff]  ;;  %v351_v0 = vld [vmem:[#allocation6 + $0x118] sm:$0xff]  ;;  %v350_v2 = vld [vmem:[#allocation6 + $0x110] sm:$0xff]  ;;  %v882_v10 = vsub.s32 0, %v117_v9  ;;  %v126_v11 = vsub.s32 2, %v117_v9  ;;  %v887_v13 = vsub.s32 1, %v117_v9 }
  0x67   :  { %429 = vmatpush2.msra.mxu0 %v374_v18  ;;  %578 = vmatpush2.msra.mxu1 %v523_v19  ;;  %v501_v63 = vld [vmem:[#allocation7 + $0x120] sm:$0xff]  ;;  %v500_v1 = vld [vmem:[#allocation7 + $0x118] sm:$0xff]  ;;  %v499_v3 = vld [vmem:[#allocation7 + $0x110] sm:$0xff]  ;;  %v130_v14 = vsub.s32 3, %v117_v9 }
  0x68   :  { %430 = vmatprep.subr.mxu0 %v373_v20  ;;  %579 = vmatprep.subr.mxu1 %v522_v21  ;;  %v349_v4 = vld [vmem:[#allocation6 + $0x108] sm:$0xff]  ;;  %v348_v6 = vld [vmem:[#allocation6 + $0x100] sm:$0xff]  ;;  %v109_v12 = vld [vmem:[%s922_s3] sm:$0xf] }
  0x69   :  { %431 = vmatpush2.msra.mxu0 %v372_v22  ;;  %580 = vmatpush2.msra.mxu1 %v521_v23  ;;  %v498_v5 = vld [vmem:[#allocation7 + $0x108] sm:$0xff]  ;;  %v497_v7 = vld [vmem:[#allocation7 + $0x100] sm:$0xff]  ;;  %v119_v15 = vrot.slane %v109_v12, %v882_v10  ;;  %v127_v16 = vrot.slane %v109_v12, %v126_v11  ;;  %v123_v18 = vrot.slane %v109_v12, %v887_v13  ;;  %v286_v21 = vld [vmem:[#allocation4] sm:$0xf] }
  0x6a   :  { %432 = vmatprep.subr.mxu0 %v371_v24  ;;  %581 = vmatprep.subr.mxu1 %v520_v25  ;;  %v131_v19 = vrot.slane %v109_v12, %v130_v14  ;;  %v670_v12 = vld [vmem:[#allocation9] ss:$0 sm:$0xff] }
  0x6b   :  { %433 = vmatpush2.msra.mxu0 %v370_v26  ;;  %582 = vmatpush2.msra.mxu1 %v519_v27  ;;  %v291_v26 = vrot.slane %v286_v21, %v882_v10 }
  0x6c   :  { %434 = vmatprep.subr.mxu0 %v369_v28  ;;  %583 = vmatprep.subr.mxu1 %v518_v29  ;;  %v299_v28 = vrot.slane %v286_v21, %v126_v11 }
  0x6d   :  { %435 = vmatpush2.msra.mxu0 %v368_v30  ;;  %584 = vmatpush2.msra.mxu1 %v517_v31  ;;  %v295_v31 = vrot.slane %v286_v21, %v887_v13 }
  0x6e   :  { %436 = vmatprep.subr.mxu0 %v367_v32  ;;  %585 = vmatprep.subr.mxu1 %v516_v33  ;;  %v303_v32 = vrot.slane %v286_v21, %v130_v14 }
  0x6f   :  { %437 = vmatpush2.msra.mxu0 %v366_v34  ;;  %586 = vmatpush2.msra.mxu1 %v515_v35 }
  0x70   :  { %438 = vmatprep.subr.mxu0 %v365_v36  ;;  %587 = vmatprep.subr.mxu1 %v514_v37 }
  0x71   :  { %439 = vmatpush2.msra.mxu0 %v364_v38  ;;  %588 = vmatpush2.msra.mxu1 %v513_v39 }
  0x72   :  { %440 = vmatprep.subr.mxu0 %v363_v40  ;;  %589 = vmatprep.subr.mxu1 %v512_v41 }
  0x73   :  { %441 = vmatpush2.msra.mxu0 %v362_v42  ;;  %590 = vmatpush2.msra.mxu1 %v511_v43 }
  0x74   :  { %442 = vmatprep.subr.mxu0 %v361_v44  ;;  %591 = vmatprep.subr.mxu1 %v510_v45  ;;  %v380_v45 = vld [vmem:[%s925_s6] sm:$0x3] }
  0x75   :  { %443 = vmatpush2.msra.mxu0 %v360_v46  ;;  %592 = vmatpush2.msra.mxu1 %v509_v47  ;;  %v529_v46 = vld [vmem:[%s927_s8] sm:$0x3]  ;;  %v385_v47 = vrot.slane %v380_v45, %v882_v10 }
  0x76   :  { %444 = vmatprep.subr.mxu0 %v359_v48  ;;  %593 = vmatprep.subr.mxu1 %v508_v49  ;;  %v534_v48 = vrot.slane %v529_v46, %v882_v10  ;;  %v614_v49 = vld [vmem:[%s928_s9] sm:$0x3] }
  0x77   :  { %445 = vmatpush2.msra.mxu0 %v358_v50  ;;  %594 = vmatpush2.msra.mxu1 %v507_v51  ;;  %v389_v50 = vrot.slane %v380_v45, %v887_v13  ;;  %v538_v51 = vrot.slane %v529_v46, %v887_v13 }
  0x78   :  { %446 = vmatprep.subr.mxu0 %v357_v52  ;;  %595 = vmatprep.subr.mxu1 %v506_v53  ;;  %v631_v52 = vld [vmem:[%s929_s10] sm:$0x3] }
  0x79   :  { %447 = vmatpush2.msra.mxu0 %v356_v54  ;;  %596 = vmatpush2.msra.mxu1 %v505_v55 }
  0x7a   :  { %448 = vmatprep.subr.mxu0 %v355_v56  ;;  %597 = vmatprep.subr.mxu1 %v504_v57  ;;  %v619_v57 = vrot.slane %v614_v49, %v882_v10 }
  0x7b   :  { %449 = vmatpush2.msra.mxu0 %v354_v58  ;;  %598 = vmatpush2.msra.mxu1 %v503_v59  ;;  %v623_v59 = vrot.slane %v614_v49, %v887_v13 }
  0x7c   :  { %450 = vmatprep.subr.mxu0 %v353_v60  ;;  %599 = vmatprep.subr.mxu1 %v502_v61  ;;  %v636_v61 = vrot.slane %v631_v52, %v882_v10 }
  0x7d   :  { %451 = vmatpush2.msra.mxu0 %v352_v62  ;;  %600 = vmatpush2.msra.mxu1 %v501_v63  ;;  %v640_v62 = vrot.slane %v631_v52, %v887_v13 }
  0x7e   :  { %452 = vmatprep.subr.mxu0 %v351_v0  ;;  %601 = vmatprep.subr.mxu1 %v500_v1 }
  0x7f   :  { %453 = vmatpush2.msra.mxu0 %v350_v2  ;;  %602 = vmatpush2.msra.mxu1 %v499_v3 }
  0x80   :  { %454 = vmatprep.subr.mxu0 %v349_v4  ;;  %603 = vmatprep.subr.mxu1 %v498_v5 }
  0x81   :  { %455 = vmatpush2.msra.mxu0 %v348_v6  ;;  %604 = vmatpush2.msra.mxu1 %v497_v7 }
  0xbc   :  { %v113_v17 = vpop.permute.xlu0 %112 }
  0xbd   :  { %v136_v20 = vmul.f32 %v119_v15, %v113_v17  ;;  %v138_v22 = vmul.f32 %v127_v16, %v113_v17  ;;  %v137_v23 = vmul.f32 %v123_v18, %v113_v17  ;;  %v139_v24 = vmul.f32 %v131_v19, %v113_v17 }
 0x100   :  { %v210_v25 = vpop.f32.mrf.mxu0 }
 0x101   :  { %v281_v27 = vpop.f32.mrf.mxu1  ;;  %v211_v29 = vadd.f32 %v210_v25, %v136_v20 }
 0x102   :  { %v282_v30 = vadd.f32 %v281_v27, %v138_v22  ;;  %v212_v33 = vpop.f32.mrf.mxu0 }
 0x103   :  { %v283_v34 = vpop.f32.mrf.mxu1  ;;  %v213_v35 = vadd.f32 %v212_v33, %v137_v23  ;;  %v308_v37 = vadd.f32 %v291_v26, %v211_v29 }
 0x104   :  { %v284_v36 = vadd.f32 %v283_v34, %v139_v24  ;;  %v310_v38 = vadd.f32 %v299_v28, %v282_v30 }
 0x105   :  { %v309_v39 = vadd.f32 %v295_v31, %v213_v35  ;;  %v312_v43 = vmax.f32 %v308_v37, 0.0 }
 0x106   :  { %v311_v40 = vadd.f32 %v303_v32, %v284_v36  ;;  %v314_v44 = vmax.f32 %v310_v38, 0.0 }
 0x107   :  { %v313_v41 = vmax.f32 %v309_v39, 0.0 }
 0x108   :  { %v315_v42 = vmax.f32 %v311_v40, 0.0 }
 0x109   :  { %456 = vmatprep.mubr.f32.mxu0 %v313_v41 }
 0x10a   :  { %605 = vmatprep.mubr.f32.mxu1 %v315_v42  ;;  %457 = vmatmul.mubr.f32.vlgmr.msra.gmra.mxu0 %v312_v43 }
 0x10b   :  { %606 = vmatmul.mubr.f32.vlgmr.msra.gmra.mxu1 %v314_v44 }
 0x1ca   :  { %v458_v53 = vpop.f32.mrf.mxu0 }
 0x1cb   :  { %v607_v54 = vpop.f32.mrf.mxu1  ;;  %v459_v55 = vadd.f32 %v458_v53, %v385_v47 }
 0x1cc   :  { %v608_v56 = vadd.f32 %v607_v54, %v534_v48  ;;  %v460_v58 = vpop.f32.mrf.mxu0 }
 0x1cd   :  { %v609_v60 = vpop.f32.mrf.mxu1  ;;  %v463_v63 = vmax.f32 %v459_v55, 0.0  ;;  %v461_v1 = vadd.f32 %v460_v58, %v389_v50 }
 0x1ce   :  { %v612_v0 = vmax.f32 %v608_v56, 0.0  ;;  %v610_v2 = vadd.f32 %v609_v60, %v538_v51 }
 0x1cf   :  { %v464_v3 = vmax.f32 %v461_v1, 0.0  ;;  %v626_v5 = vmul.f32 %v619_v57, %v463_v63 }
 0x1d0   :  { %v613_v4 = vmax.f32 %v610_v2, 0.0  ;;  %v643_v7 = vmul.f32 %v636_v61, %v612_v0 }
 0x1d1   :  { %v627_v6 = vmul.f32 %v623_v59, %v464_v3 }
 0x1d2   :  { %v644_v8 = vmul.f32 %v640_v62, %v613_v4 }
 0x1d3   :  { %v628_v11 = vadd.f32 %v627_v6, %v626_v5 }
 0x1d4   :  { %v645_v9 = vadd.f32 %v644_v8, %v643_v7 }
 0x1d5   :  { %629 = vadd.xlane.f32.xlu0 %v628_v11 }
 0x1d6   :  { %646 = vadd.xlane.f32.xlu1 %v645_v9 }
 0x25e   :  { %v630_v10 = vpop.xlane.xlu0 %629 }
 0x25f   :  { %v647_v14 = vpop.xlane.xlu1 %646  ;;  %v655_v13 = vadd.f32 %v670_v12, %v630_v10 }
 0x260   :  { %v658_v15 = vadd.f32 %v670_v12, %v647_v14 }
 0x261   :  { %657 = vst.msk [vmem:[%s931_s12] sm:$0xff] %vm656_vm1, %v655_v13 }
 0x262   :  { %660 = vst.msk [vmem:[%s931_s12] sm:$0xff] %vm659_vm2, %v658_v15 }
 0x263   :  { %665 = vsyncpa [#allocation3], 1 }
 0x264   :  { %666 = vsyncpa [#allocation5], 1 }
 0x265   :  { %667 = vsyncpa [#allocation8], 1 }

</bundles_post_ra>
